<compile_context>
chip_gen: v7x
topology: tpu7x:2x2x1
jax: 0.10.0
libtpu: 0.0.40
codegen_flags: <defaults>
</compile_context>

<pallas_src>
import math

import jax
import jax.numpy as jnp
from jax.experimental import pallas as pl
from jax.experimental.pallas import tpu as pltpu

LANE = 128
SUBLANE = 8


def _round_up(x, m):
    return ((x + m - 1) // m) * m


def _cdiv(a, b):
    return -(-a // b)


def _backward_ann_kernel(x_ref,
                         w1_ref, b1_ref,
                         w2_ref, b2_ref,
                         w3_ref, b3_ref,
                         w4_ref, b4_ref,
                         o_ref):
    """Fused 4x (Linear + ReLU): bf16 MXU matmuls, f32 accumulation/bias/ReLU."""
    x = x_ref[...].astype(jnp.bfloat16)                 # (tile_b, num_outs), cast in-kernel

    h = jnp.dot(x, w1_ref[...], preferred_element_type=jnp.float32)
    h = jnp.maximum(h + b1_ref[...], 0.0)

    h = jnp.dot(h.astype(jnp.bfloat16), w2_ref[...],
                preferred_element_type=jnp.float32)
    h = jnp.maximum(h + b2_ref[...], 0.0)

    h = jnp.dot(h.astype(jnp.bfloat16), w3_ref[...],
                preferred_element_type=jnp.float32)
    h = jnp.maximum(h + b3_ref[...], 0.0)

    h = jnp.dot(h.astype(jnp.bfloat16), w4_ref[...],
                preferred_element_type=jnp.float32)
    h = jnp.maximum(h + b4_ref[...], 0.0)

    o_ref[...] = h.astype(o_ref.dtype)                  # (tile_b, num_ins) dense store


def prepare_params(params):
    """One-time glue. PyTorch Linear stores (out, in); transpose to (in, out),
    zero-pad to 128 only where the neighbouring activation is 128-padded,
    cast weights to bf16 (bias stays f32).

    Padding plan (input dim, output dim):
      w1: (num_outs, 128)   -- input stays at num_outs (kernel input is unpadded)
      w2: (128, 128)
      w3: (128, 128)
      w4: (128, num_ins)    -- output stays at num_ins (kernel output is unpadded)
    """
    def prep(w, b, pad_in, pad_out):
        out_f, in_f = w.shape
        in_p = _round_up(in_f, LANE) if pad_in else in_f
        out_p = _round_up(out_f, LANE) if pad_out else out_f
        wt = jnp.zeros((in_p, out_p), jnp.bfloat16)
        wt = wt.at[:in_f, :out_f].set(w.T.astype(jnp.bfloat16))
        bp = jnp.zeros((1, out_p), jnp.float32).at[0, :out_f].set(b)
        return wt, bp

    (w1, b1), (w2, b2), (w3, b3), (w4, b4) = params
    return [prep(w1, b1, False, True),
            prep(w2, b2, True, True),
            prep(w3, b3, True, True),
            prep(w4, b4, True, False)]


def backward_ann_forward(x, prepped, num_ins, *, max_tile_b=1024):
    """x: (B, numOuts) float32; prepped: output of prepare_params.
    Returns (B, 1, ins, ins) exactly like the PyTorch module."""
    (w1, b1), (w2, b2), (w3, b3), (w4, b4) = prepped
    B, num_outs = x.shape
    ins = int(math.isqrt(num_ins))

    # Padding-aware tiling: minimize batch padding, cap tiles at max_tile_b,
    # and split into >=2 steps when possible so v7x megacore sees parallel work.
    min_steps = 2 if B >= 2 * SUBLANE else 1
    steps = max(min_steps, _cdiv(B, max_tile_b))
    tile_b = _round_up(_cdiv(B, steps), SUBLANE)
    grid_b = _cdiv(B, tile_b)
    b_pad = grid_b * tile_b

    # Glue: only cheap row padding (if any); no feature padding, no dtype cast.
    xp = x if b_pad == B else jnp.pad(x, ((0, b_pad - B), (0, 0)))

    const = lambda i: (0, 0)   # weights/biases stay VMEM-resident across the grid

    # Advisory cost hint, consistent with actual kernel work / HBM footprint.
    flops = 2 * b_pad * sum(int(w.shape[0]) * int(w.shape[1]) for (w, _) in prepped)
    bytes_accessed = (b_pad * num_outs * 4            # x read (f32, unpadded)
                      + b_pad * num_ins * 4           # out write (f32, unpadded)
                      + sum(int(w.size) * 2 + int(b.size) * 4 for (w, b) in prepped))

    out_padded = pl.pallas_call(
        _backward_ann_kernel,
        out_shape=jax.ShapeDtypeStruct((b_pad, num_ins), jnp.float32),
        grid=(grid_b,),
        in_specs=[
            pl.BlockSpec((tile_b, num_outs), lambda i: (i, 0)),
            pl.BlockSpec(w1.shape, const), pl.BlockSpec(b1.shape, const),
            pl.BlockSpec(w2.shape, const), pl.BlockSpec(b2.shape, const),
            pl.BlockSpec(w3.shape, const), pl.BlockSpec(b3.shape, const),
            pl.BlockSpec(w4.shape, const), pl.BlockSpec(b4.shape, const),
        ],
        out_specs=pl.BlockSpec((tile_b, num_ins), lambda i: (i, 0)),
        compiler_params=pltpu.CompilerParams(
            dimension_semantics=("parallel",),
            vmem_limit_bytes=32 * 1024 * 1024,
        ),
        cost_estimate=pl.CostEstimate(
            flops=flops, transcendentals=0, bytes_accessed=bytes_accessed),
    )(xp, w1, b1, w2, b2, w3, b3, w4, b4)

    # Glue: drop batch padding (if any); match PyTorch's `x.view(-1, 1, ins, ins)`.
    out = out_padded if b_pad == B else out_padded[:B]
    return out.reshape(-1, 1, ins, ins)


def init_params(key, num_ins, num_outs):
    """Deterministic init with PyTorch Linear shapes:
       in_to_one: (25, numOuts), one_to_two: (55, 25),
       two_to_three: (80, 55), three_to_out: (numIns, 80)."""
    dims = [(num_outs, 25), (25, 55), (55, 80), (80, num_ins)]
    params = []
    for (fan_in, fan_out) in dims:
        key, kw, kb = jax.random.split(key, 3)
        bound = 1.0 / math.sqrt(fan_in)
        w = jax.random.uniform(kw, (fan_out, fan_in), jnp.float32, -bound, bound)
        b = jax.random.uniform(kb, (fan_out,), jnp.float32, -bound, bound)
        params.append((w, b))
    return params


def reference_forward_f32(x, params, num_ins):
    """Pure-f32 JAX reference of the PyTorch forward."""
    h = x
    for (w, b) in params:
        h = jnp.maximum(h @ w.T + b, 0.0)
    ins = int(math.isqrt(num_ins))
    return h.reshape(-1, 1, ins, ins)


def reference_forward_bf16(x, params, num_ins):
    """JAX reference using the same bf16-matmul / f32-accumulate recipe as the kernel."""
    h = x.astype(jnp.bfloat16)
    hf = None
    for (w, b) in params:
        acc = jnp.dot(h, w.T.astype(jnp.bfloat16),
                      preferred_element_type=jnp.float32)
        hf = jnp.maximum(acc + b, 0.0)
        h = hf.astype(jnp.bfloat16)
    ins = int(math.isqrt(num_ins))
    return hf.reshape(-1, 1, ins, ins)


if __name__ == "__main__":
    # Small shapes consistent with the module: numIns must be a perfect square.
    num_ins = 64     # -> ins = 8, output (B, 1, 8, 8)
    num_outs = 16
    batch = 8

    key = jax.random.PRNGKey(0)
    key, kx = jax.random.split(key)
    x = jax.random.normal(kx, (batch, num_outs), jnp.float32)

    params = init_params(key, num_ins, num_outs)
    prepped = prepare_params(params)        # one-time transpose/pad/cast

    out = backward_ann_forward(x, prepped, num_ins)
    out = jax.block_until_ready(out)

    ref_bf16 = reference_forward_bf16(x, params, num_ins)
    ref_f32 = reference_forward_f32(x, params, num_ins)

    assert out.shape == (batch, 1, 8, 8), out.shape
    # Tight check against the bf16-consistent reference (validates kernel math).
    assert jnp.allclose(out, ref_bf16, atol=1e-3, rtol=1e-2), "mismatch vs bf16 reference"
    # Loose check against the pure-f32 reference (bf16 matmul precision).
    assert jnp.allclose(out, ref_f32, atol=1e-1, rtol=1e-1), "mismatch vs f32 reference"

    # Also exercise a batch that needs row padding and multiple grid steps.
    batch2 = 37
    key, kx2 = jax.random.split(key)
    x2 = jax.random.normal(kx2, (batch2, num_outs), jnp.float32)
    out2 = jax.block_until_ready(backward_ann_forward(x2, prepped, num_ins))
    ref2 = reference_forward_bf16(x2, params, num_ins)
    assert out2.shape == (batch2, 1, 8, 8), out2.shape
    assert jnp.allclose(out2, ref2, atol=1e-3, rtol=1e-2), "mismatch (padded batch)"

    print("KERNEL_OK")
</pallas_src>

<mosaic_0001>
module attributes {stable_mosaic.version = 11 : i64} {
  func.func @_backward_ann_kernel(%arg0: i32, %arg1: memref<8x16xf32, #tpu.memory_space<vmem>>, %arg2: memref<16x128xbf16, #tpu.memory_space<vmem>>, %arg3: memref<1x128xf32, #tpu.memory_space<vmem>>, %arg4: memref<128x128xbf16, #tpu.memory_space<vmem>>, %arg5: memref<1x128xf32, #tpu.memory_space<vmem>>, %arg6: memref<128x128xbf16, #tpu.memory_space<vmem>>, %arg7: memref<1x128xf32, #tpu.memory_space<vmem>>, %arg8: memref<128x64xbf16, #tpu.memory_space<vmem>>, %arg9: memref<1x64xf32, #tpu.memory_space<vmem>>, %arg10: memref<8x64xf32, #tpu.memory_space<vmem>>) attributes {dimension_semantics = [#tpu.dimension_semantics<parallel>], iteration_bounds = array<i64: 1>, scalar_prefetch = 0 : i64, scratch_operands = 0 : i64, tpu.core_type = #tpu.core_type<tc>, window_params = [{transform_indices = @transform_0, window_bounds = array<i64: 8, 16>}, {pipeline_mode = #tpu.pipeline_mode<synchronous>, transform_indices = @transform_1, window_bounds = array<i64: 16, 128>}, {pipeline_mode = #tpu.pipeline_mode<synchronous>, transform_indices = @transform_2, window_bounds = array<i64: 1, 128>}, {pipeline_mode = #tpu.pipeline_mode<synchronous>, transform_indices = @transform_3, window_bounds = array<i64: 128, 128>}, {pipeline_mode = #tpu.pipeline_mode<synchronous>, transform_indices = @transform_4, window_bounds = array<i64: 1, 128>}, {pipeline_mode = #tpu.pipeline_mode<synchronous>, transform_indices = @transform_5, window_bounds = array<i64: 128, 128>}, {pipeline_mode = #tpu.pipeline_mode<synchronous>, transform_indices = @transform_6, window_bounds = array<i64: 1, 128>}, {pipeline_mode = #tpu.pipeline_mode<synchronous>, transform_indices = @transform_7, window_bounds = array<i64: 128, 64>}, {pipeline_mode = #tpu.pipeline_mode<synchronous>, transform_indices = @transform_8, window_bounds = array<i64: 1, 64>}, {transform_indices = @transform_9, window_bounds = array<i64: 8, 64>}]} {
    %c0 = arith.constant 0 : index
    %c0_0 = arith.constant 0 : index
    %0 = vector.load %arg1[%c0, %c0_0] : memref<8x16xf32, #tpu.memory_space<vmem>>, vector<8x16xf32>
    %1 = arith.truncf %0 : vector<8x16xf32> to vector<8x16xbf16>
    %c0_1 = arith.constant 0 : index
    %c0_2 = arith.constant 0 : index
    %2 = vector.load %arg2[%c0_1, %c0_2] : memref<16x128xbf16, #tpu.memory_space<vmem>>, vector<16x128xbf16>
    %cst = arith.constant dense<0.000000e+00> : vector<8x128xf32>
    %3 = tpu.matmul %1, %2, %cst {dimension_numbers = #tpu.dot_dimension_numbers<[1], [0], [0], [1], [0, 0, 1, 1], [], []>} : vector<8x16xbf16>, vector<16x128xbf16>, vector<8x128xf32> -> vector<8x128xf32>
    %c0_3 = arith.constant 0 : index
    %c0_4 = arith.constant 0 : index
    %4 = vector.load %arg3[%c0_3, %c0_4] : memref<1x128xf32, #tpu.memory_space<vmem>>, vector<1x128xf32>
    %5 = vector.broadcast %4 : vector<1x128xf32> to vector<8x128xf32>
    %6 = arith.addf %3, %5 : vector<8x128xf32>
    %cst_5 = arith.constant 0.000000e+00 : f32
    %7 = vector.broadcast %cst_5 : f32 to vector<8x128xf32>
    %8 = arith.maximumf %6, %7 : vector<8x128xf32>
    %9 = arith.truncf %8 : vector<8x128xf32> to vector<8x128xbf16>
    %c0_6 = arith.constant 0 : index
    %c0_7 = arith.constant 0 : index
    %10 = vector.load %arg4[%c0_6, %c0_7] : memref<128x128xbf16, #tpu.memory_space<vmem>>, vector<128x128xbf16>
    %cst_8 = arith.constant dense<0.000000e+00> : vector<8x128xf32>
    %11 = tpu.matmul %9, %10, %cst_8 {dimension_numbers = #tpu.dot_dimension_numbers<[1], [0], [0], [1], [0, 0, 1, 1], [], []>} : vector<8x128xbf16>, vector<128x128xbf16>, vector<8x128xf32> -> vector<8x128xf32>
    %c0_9 = arith.constant 0 : index
    %c0_10 = arith.constant 0 : index
    %12 = vector.load %arg5[%c0_9, %c0_10] : memref<1x128xf32, #tpu.memory_space<vmem>>, vector<1x128xf32>
    %13 = vector.broadcast %12 : vector<1x128xf32> to vector<8x128xf32>
    %14 = arith.addf %11, %13 : vector<8x128xf32>
    %cst_11 = arith.constant 0.000000e+00 : f32
    %15 = vector.broadcast %cst_11 : f32 to vector<8x128xf32>
    %16 = arith.maximumf %14, %15 : vector<8x128xf32>
    %17 = arith.truncf %16 : vector<8x128xf32> to vector<8x128xbf16>
    %c0_12 = arith.constant 0 : index
    %c0_13 = arith.constant 0 : index
    %18 = vector.load %arg6[%c0_12, %c0_13] : memref<128x128xbf16, #tpu.memory_space<vmem>>, vector<128x128xbf16>
    %cst_14 = arith.constant dense<0.000000e+00> : vector<8x128xf32>
    %19 = tpu.matmul %17, %18, %cst_14 {dimension_numbers = #tpu.dot_dimension_numbers<[1], [0], [0], [1], [0, 0, 1, 1], [], []>} : vector<8x128xbf16>, vector<128x128xbf16>, vector<8x128xf32> -> vector<8x128xf32>
    %c0_15 = arith.constant 0 : index
    %c0_16 = arith.constant 0 : index
    %20 = vector.load %arg7[%c0_15, %c0_16] : memref<1x128xf32, #tpu.memory_space<vmem>>, vector<1x128xf32>
    %21 = vector.broadcast %20 : vector<1x128xf32> to vector<8x128xf32>
    %22 = arith.addf %19, %21 : vector<8x128xf32>
    %cst_17 = arith.constant 0.000000e+00 : f32
    %23 = vector.broadcast %cst_17 : f32 to vector<8x128xf32>
    %24 = arith.maximumf %22, %23 : vector<8x128xf32>
    %25 = arith.truncf %24 : vector<8x128xf32> to vector<8x128xbf16>
    %c0_18 = arith.constant 0 : index
    %c0_19 = arith.constant 0 : index
    %26 = vector.load %arg8[%c0_18, %c0_19] : memref<128x64xbf16, #tpu.memory_space<vmem>>, vector<128x64xbf16>
    %cst_20 = arith.constant dense<0.000000e+00> : vector<8x64xf32>
    %27 = tpu.matmul %25, %26, %cst_20 {dimension_numbers = #tpu.dot_dimension_numbers<[1], [0], [0], [1], [0, 0, 1, 1], [], []>} : vector<8x128xbf16>, vector<128x64xbf16>, vector<8x64xf32> -> vector<8x64xf32>
    %c0_21 = arith.constant 0 : index
    %c0_22 = arith.constant 0 : index
    %28 = vector.load %arg9[%c0_21, %c0_22] : memref<1x64xf32, #tpu.memory_space<vmem>>, vector<1x64xf32>
    %29 = vector.broadcast %28 : vector<1x64xf32> to vector<8x64xf32>
    %30 = arith.addf %27, %29 : vector<8x64xf32>
    %cst_23 = arith.constant 0.000000e+00 : f32
    %31 = vector.broadcast %cst_23 : f32 to vector<8x64xf32>
    %32 = arith.maximumf %30, %31 : vector<8x64xf32>
    %c0_24 = arith.constant 0 : index
    %c0_25 = arith.constant 0 : index
    %33 = vector.load %arg10[%c0_24, %c0_25] : memref<8x64xf32, #tpu.memory_space<vmem>>, vector<8x64xf32>
    tpu.vector_store %arg10[%c0_24, %c0_25], %32 {strides = array<i32>} : memref<8x64xf32, #tpu.memory_space<vmem>>, vector<8x64xf32>,
    return
  }
  func.func @transform_0(%arg0: i32) -> (i32, i32) {
    %c0_i32 = arith.constant 0 : i32
    %c0_i32_0 = arith.constant 0 : i32
    return %arg0, %c0_i32 : i32, i32
  }
  func.func @transform_1(%arg0: i32) -> (i32, i32) {
    %c0_i32 = arith.constant 0 : i32
    %c0_i32_0 = arith.constant 0 : i32
    %c0_i32_1 = arith.constant 0 : i32
    return %c0_i32, %c0_i32_0 : i32, i32
  }
  func.func @transform_2(%arg0: i32) -> (i32, i32) {
    %c0_i32 = arith.constant 0 : i32
    %c0_i32_0 = arith.constant 0 : i32
    %c0_i32_1 = arith.constant 0 : i32
    return %c0_i32, %c0_i32_0 : i32, i32
  }
  func.func @transform_3(%arg0: i32) -> (i32, i32) {
    %c0_i32 = arith.constant 0 : i32
    %c0_i32_0 = arith.constant 0 : i32
    %c0_i32_1 = arith.constant 0 : i32
    return %c0_i32, %c0_i32_0 : i32, i32
  }
  func.func @transform_4(%arg0: i32) -> (i32, i32) {
    %c0_i32 = arith.constant 0 : i32
    %c0_i32_0 = arith.constant 0 : i32
    %c0_i32_1 = arith.constant 0 : i32
    return %c0_i32, %c0_i32_0 : i32, i32
  }
  func.func @transform_5(%arg0: i32) -> (i32, i32) {
    %c0_i32 = arith.constant 0 : i32
    %c0_i32_0 = arith.constant 0 : i32
    %c0_i32_1 = arith.constant 0 : i32
    return %c0_i32, %c0_i32_0 : i32, i32
  }
  func.func @transform_6(%arg0: i32) -> (i32, i32) {
    %c0_i32 = arith.constant 0 : i32
    %c0_i32_0 = arith.constant 0 : i32
    %c0_i32_1 = arith.constant 0 : i32
    return %c0_i32, %c0_i32_0 : i32, i32
  }
  func.func @transform_7(%arg0: i32) -> (i32, i32) {
    %c0_i32 = arith.constant 0 : i32
    %c0_i32_0 = arith.constant 0 : i32
    %c0_i32_1 = arith.constant 0 : i32
    return %c0_i32, %c0_i32_0 : i32, i32
  }
  func.func @transform_8(%arg0: i32) -> (i32, i32) {
    %c0_i32 = arith.constant 0 : i32
    %c0_i32_0 = arith.constant 0 : i32
    %c0_i32_1 = arith.constant 0 : i32
    return %c0_i32, %c0_i32_0 : i32, i32
  }
  func.func @transform_9(%arg0: i32) -> (i32, i32) {
    %c0_i32 = arith.constant 0 : i32
    %c0_i32_0 = arith.constant 0 : i32
    return %arg0, %c0_i32 : i32, i32
  }
}

</mosaic_0001>

<bundles_post_ra>
// kernel: tpu_custom_call.1
= control target key start
LH: loop header
LB: loop body
LE: loop exit
PB: predicated region body
PF: predicated region fallthrough
CT: control target
= control target key end

     0   :  { %14 = vsyncpa [#allocation3], 0  ;;  %s849_s0 = inlined_call_operand.vmem [shape: f32[8,16], index: 0, kind: input, shape index: {}]   ;;  %s850_s1 = inlined_call_operand.vmem [shape: bf16[16,128], index: 1, kind: input, shape index: {}]   ;;  %s851_s2 = inlined_call_operand.vmem [shape: f32[1,128], index: 2, kind: input, shape index: {}]   ;;  %s852_s3 = inlined_call_operand.vmem [shape: bf16[128,128], index: 3, kind: input, shape index: {}]   ;;  %s853_s4 = inlined_call_operand.vmem [shape: f32[1,128], index: 4, kind: input, shape index: {}]   ;;  %s854_s5 = inlined_call_operand.hbm [shape: bf16[128,128], index: 5, kind: input, shape index: {}]   ;;  %s855_s6 = inlined_call_operand.vmem [shape: f32[1,128], index: 6, kind: input, shape index: {}]   ;;  %s856_s7 = inlined_call_operand.vmem [shape: bf16[128,64], index: 7, kind: input, shape index: {}]   ;;  %s857_s8 = inlined_call_operand.vmem [shape: f32[1,64], index: 8, kind: input, shape index: {}]   ;;  %s858_s9 = inlined_call_operand.hbm [shape: f32[8,64], index: 9, kind: output, shape index: {}]  }
   0x1   :  { %15 = vsyncpa [#allocation4], 0  ;;  %s670_s30 = smov [#allocation2]   ;;  %s622_s13 = scalar_lea.hbm %s854_s5, 1024 }
   0x2   :  { %s31_s10 = sshll.u32 %s670_s30, 4  ;;  %p623_p0 = scmp.ne.s32.totalorder %s854_s5, %s622_s13  ;;  %s32_s10 = int_to_ptr.vmem [resolvable:$true] %s31_s10 }
   0x3   :  { %p626_p1 = scmp.lt.u32.totalorder %s622_s13, %s854_s5 }
   0x5   :  { %p628_p2 = pnand %p626_p1, %p623_p0 }
   0x7   :  { %631 = shalt.err (!%p628_p2)
}
   0x8   :  { %s632_s18 = scalar_lea.vmem %s32_s10, 1024  ;;  %p637_p4 = scmp.lt.s32.totalorder %s32_s10, %s32_s10 }
   0x9   :  { %p633_p3 = scmp.ne.s32.totalorder %s32_s10, %s632_s18  ;;  %p638_p5 = scmp.lt.s32.totalorder %s632_s18, %s632_s18 }
   0xb   :  { %p639_p6 = por %p638_p5, %p637_p4 }
   0xd   :  { %p640_p7 = pnand %p639_p6, %p633_p3 }
   0xf   :  { %643 = shalt.err (!%p640_p7)
}
  0x10   :  { %s671_s19 = smov 64   ;;  %s672_s20 = smov 4  }
  0x11   :  { %37 = dma.hbm_to_vmem [thread:$0]  %s854_s5, 1024, %s32_s10, [#allocation3], %s671_s19, %s671_s19, %s672_s20  }
  0x12   :  { %666 = dma.done.wait [#allocation3], 1024  }
  0x13   :  { %667 = vsyncadd [#allocation3], 4294966272  ;;  %v673_v0 = vmov 0.0   ;;  %vm674_vm0 = vmmov 0   ;;  %v597_v1 = vld [vmem:[%s850_s1] sm:$0xff]   ;;  %vm65_vm1 = vcmask 130048  }
  0x14   :  { %525 = vmatprep.subr.bf16.mxu0 %v673_v0  ;;  %527 = vmatprep.mubr.msk.bf16.mxu0 %vm674_vm0, %v673_v0  ;;  %v48_v2 = vld [vmem:[%s849_s0] sm:$0xff]  ;;  %v599_v5 = vld [vmem:[%s852_s3 + $0x8] sm:$0xff]   ;;  %v600_v6 = vld [vmem:[%s852_s3 + $0x10] sm:$0xff]   ;;  %s675_s16 = smov [#allocation5]   ;;  %vm449_vm2 = vcmask 523264  }
  0x15   :  { %531 = vmatprep.subr.bf16.mxu1 %v673_v0  ;;  %547 = vmatprep.mubr.msk.bf16.mxu1 %vm674_vm0, %v673_v0  ;;  %v49_v3 = vpack.c.bf16 %v48_v2, %v48_v2  ;;  %v598_v4 = vld [vmem:[%s852_s3] sm:$0xff]   ;;  %v601_v7 = vld [vmem:[%s852_s3 + $0x18] sm:$0xff]   ;;  %v603_v9 = vld [vmem:[%s852_s3 + $0x28] sm:$0xff]  }
  0x16   :  { %526 = vmatpush3.bf16.msra.mxu0 %v597_v1  ;;  %532 = vmatpush3.bf16.msra.mxu1 %v598_v4  ;;  %v602_v8 = vld [vmem:[%s852_s3 + $0x20] sm:$0xff]   ;;  %v604_v10 = vld [vmem:[%s852_s3 + $0x30] sm:$0xff]   ;;  %v605_v11 = vld [vmem:[%s852_s3 + $0x38] sm:$0xff]  }
  0x17   :  { %551 = vmatprep.subr.bf16.mxu0 %v673_v0  ;;  %533 = vmatprep.subr.bf16.mxu1 %v673_v0  ;;  %v606_v12 = vld [vmem:[#allocation2] sm:$0xff]   ;;  %v607_v13 = vld [vmem:[#allocation2 + $0x8] sm:$0xff]   ;;  %v608_v14 = vld [vmem:[#allocation2 + $0x10] sm:$0xff]  }
  0x18   :  { %v609_v15 = vld [vmem:[#allocation2 + $0x18] sm:$0xff]   ;;  %v610_v16 = vld [vmem:[#allocation2 + $0x20] sm:$0xff]   ;;  %v611_v17 = vld [vmem:[#allocation2 + $0x28] sm:$0xff]  }
  0x19   :  { %528 = vmatmul.mubr.msk.bf16.vlgmr.msra.gmra.mrb[0].mxu0 %vm65_vm1, %v49_v3  ;;  %v466_v18 = vld [vmem:[%s851_s2] ss:$0 sm:$0xff]  ;;  %v612_v26 = vld [vmem:[#allocation2 + $0x30] sm:$0xff]   ;;  %v613_v27 = vld [vmem:[#allocation2 + $0x38] sm:$0xff]  }
  0x1a   :  { %567 = vmatprep.mubr.msk.bf16.mxu0 %vm674_vm0, %v673_v0  ;;  %534 = vmatpush3.bf16.msra.mxu1 %v599_v5  ;;  %v614_v28 = vld [vmem:[%s856_s7] sm:$0xff]   ;;  %v615_v29 = vld [vmem:[%s856_s7 + $0x8] sm:$0xff]   ;;  %v616_v30 = vld [vmem:[%s856_s7 + $0x10] sm:$0xff]  }
  0x1b   :  { %535 = vmatprep.subr.bf16.mxu1 %v673_v0  ;;  %552 = vmatpush3.bf16.msra.mxu0 %v606_v12  ;;  %v617_v31 = vld [vmem:[%s856_s7 + $0x18] sm:$0xff]   ;;  %v618_v32 = vld [vmem:[%s856_s7 + $0x20] sm:$0xff]   ;;  %v619_v33 = vld [vmem:[%s856_s7 + $0x28] sm:$0xff]  }
  0x1c   :  { %553 = vmatprep.subr.bf16.mxu0 %v673_v0  ;;  %v469_v34 = vld [vmem:[%s853_s4] ss:$0 sm:$0xff]  ;;  %v620_v42 = vld [vmem:[%s856_s7 + $0x30] sm:$0xff]   ;;  %v621_v43 = vld [vmem:[%s856_s7 + $0x38] sm:$0xff]   ;;  %s457_s7 = sshll.u32 %s675_s16, 4  ;;  %s458_s7 = int_to_ptr.vmem [resolvable:$true] %s457_s7 }
  0x1d   :  { %v478_v44 = vld [vmem:[%s855_s6] ss:$0 sm:$0xff]  ;;  %s644_s6 = scalar_lea.vmem %s458_s7, 128  ;;  %p649_p9 = scmp.lt.s32.totalorder %s458_s7, %s458_s7 }
  0x1e   :  { %536 = vmatpush3.bf16.msra.mxu1 %v600_v6  ;;  %v487_v52 = vld [vmem:[%s857_s8] ss:$0 sm:$0xff]  ;;  %p645_p8 = scmp.ne.s32.totalorder %s458_s7, %s644_s6  ;;  %p650_p10 = scmp.lt.s32.totalorder %s644_s6, %s644_s6 }
  0x1f   :  { %537 = vmatprep.subr.bf16.mxu1 %v673_v0  ;;  %554 = vmatpush3.bf16.msra.mxu0 %v607_v13 }
  0x20   :  { %555 = vmatprep.subr.bf16.mxu0 %v673_v0  ;;  %p651_p11 = por %p650_p10, %p649_p9 }
  0x22   :  { %538 = vmatpush3.bf16.msra.mxu1 %v601_v7  ;;  %p652_p12 = pnand %p651_p11, %p645_p8 }
  0x23   :  { %539 = vmatprep.subr.bf16.mxu1 %v673_v0  ;;  %556 = vmatpush3.bf16.msra.mxu0 %v608_v14 }
  0x24   :  { %557 = vmatprep.subr.bf16.mxu0 %v673_v0 }
  0x26   :  { %540 = vmatpush3.bf16.msra.mxu1 %v602_v8 }
  0x27   :  { %541 = vmatprep.subr.bf16.mxu1 %v673_v0  ;;  %558 = vmatpush3.bf16.msra.mxu0 %v609_v15 }
  0x28   :  { %559 = vmatprep.subr.bf16.mxu0 %v673_v0 }
  0x2a   :  { %542 = vmatpush3.bf16.msra.mxu1 %v603_v9 }
  0x2b   :  { %543 = vmatprep.subr.bf16.mxu1 %v673_v0  ;;  %560 = vmatpush3.bf16.msra.mxu0 %v610_v16 }
  0x2c   :  { %561 = vmatprep.subr.bf16.mxu0 %v673_v0 }
  0x2e   :  { %544 = vmatpush3.bf16.msra.mxu1 %v604_v10 }
  0x2f   :  { %545 = vmatprep.subr.bf16.mxu1 %v673_v0  ;;  %562 = vmatpush3.bf16.msra.mxu0 %v611_v17 }
  0x30   :  { %563 = vmatprep.subr.bf16.mxu0 %v673_v0 }
  0x32   :  { %546 = vmatpush3.bf16.msra.mxu1 %v605_v11 }
  0x33   :  { %571 = vmatprep.subr.bf16.mxu1 %v673_v0  ;;  %564 = vmatpush3.bf16.msra.mxu0 %v612_v26 }
  0x34   :  { %565 = vmatprep.subr.bf16.mxu0 %v673_v0 }
  0x37   :  { %566 = vmatpush3.bf16.msra.mxu0 %v613_v27 }
  0xec   :  { %v103_v19 = vpop.f32.mrb[0].mxu0 }
  0xed   :  { %v104_v20 = vadd.f32 %v466_v18, %v103_v19  ;;  %v529_v21 = vpop.f32.mrb[1].mxu0 }
  0xee   :  { %v106_v22 = vpop.f32.mrb[2].mxu0 }
  0xef   :  { %v109_v23 = vmax.f32 %v104_v20, 0.0  ;;  %v530_v24 = vpop.f32.mrb[3].mxu0 }
  0xf1   :  { %v110_v25 = vpack.c.bf16 %v109_v23, %v109_v23 }
  0xf3   :  { %548 = vmatmul.mubr.bf16.vlgmr.msra.gmra.mrb[0].mxu1 %v110_v25 }
  0xf4   :  { %587 = vmatprep.mubr.msk.bf16.mxu1 %vm674_vm0, %v673_v0  ;;  %572 = vmatpush3.bf16.msra.mxu1 %v614_v28 }
  0xf5   :  { %573 = vmatprep.subr.bf16.mxu1 %v673_v0 }
  0xf8   :  { %574 = vmatpush3.bf16.msra.mxu1 %v615_v29 }
  0xf9   :  { %575 = vmatprep.subr.bf16.mxu1 %v673_v0 }
  0xfc   :  { %576 = vmatpush3.bf16.msra.mxu1 %v616_v30 }
  0xfd   :  { %577 = vmatprep.subr.bf16.mxu1 %v673_v0 }
 0x100   :  { %578 = vmatpush3.bf16.msra.mxu1 %v617_v31 }
 0x101   :  { %579 = vmatprep.subr.bf16.mxu1 %v673_v0 }
 0x104   :  { %580 = vmatpush3.bf16.msra.mxu1 %v618_v32 }
 0x105   :  { %581 = vmatprep.subr.bf16.mxu1 %v673_v0 }
 0x108   :  { %582 = vmatpush3.bf16.msra.mxu1 %v619_v33 }
 0x109   :  { %583 = vmatprep.subr.bf16.mxu1 %v673_v0 }
 0x10c   :  { %584 = vmatpush3.bf16.msra.mxu1 %v620_v42 }
 0x10d   :  { %585 = vmatprep.subr.bf16.mxu1 %v673_v0 }
 0x110   :  { %586 = vmatpush3.bf16.msra.mxu1 %v621_v43 }
 0x1c6   :  { %v216_v35 = vpop.f32.mrb[0].mxu1 }
 0x1c7   :  { %v217_v36 = vadd.f32 %v469_v34, %v216_v35  ;;  %v549_v37 = vpop.f32.mrb[1].mxu1 }
 0x1c8   :  { %v219_v38 = vpop.f32.mrb[2].mxu1 }
 0x1c9   :  { %v222_v39 = vmax.f32 %v217_v36, 0.0  ;;  %v550_v40 = vpop.f32.mrb[3].mxu1 }
 0x1cb   :  { %v223_v41 = vpack.c.bf16 %v222_v39, %v222_v39 }
 0x1cd   :  { %568 = vmatmul.mubr.bf16.vlgmr.msra.gmra.mrb[4].mxu0 %v223_v41 }
 0x2a0   :  { %v329_v45 = vpop.f32.mrb[4].mxu0 }
 0x2a1   :  { %v330_v46 = vadd.f32 %v478_v44, %v329_v45  ;;  %v569_v47 = vpop.f32.mrb[5].mxu0 }
 0x2a2   :  { %v332_v48 = vpop.f32.mrb[6].mxu0 }
 0x2a3   :  { %v335_v49 = vmax.f32 %v330_v46, 0.0  ;;  %v570_v50 = vpop.f32.mrb[7].mxu0 }
 0x2a5   :  { %v336_v51 = vpack.c.bf16 %v335_v49, %v335_v49 }
 0x2a7   :  { %588 = vmatmul.mubr.bf16.vlgmr.msra.gmra.mrb[4].mxu1 %v336_v51 }
 0x37a   :  { %v442_v53 = vpop.f32.mrb[4].mxu1 }
 0x37b   :  { %v443_v54 = vadd.f32 %v487_v52, %v442_v53  ;;  %v589_v55 = vpop.f32.mrb[5].mxu1 }
 0x37c   :  { %v445_v56 = vpop.f32.mrb[6].mxu1 }
 0x37d   :  { %v448_v57 = vmax.f32 %v443_v54, 0.0  ;;  %v590_v58 = vpop.f32.mrb[7].mxu1 }
 0x37f   :  { %450 = vst.msk [vmem:[#allocation5] sm:$0xff] %vm449_vm2, %v448_v57 }
 0x380   :  { %655 = shalt.err (!%p652_p12)
}
 0x381   :  { %s656_s18 = scalar_lea.hbm %s858_s9, 128 }
 0x382   :  { %p657_p13 = scmp.ne.s32.totalorder %s858_s9, %s656_s18  ;;  %p660_p0 = scmp.lt.u32.totalorder %s656_s18, %s858_s9 }
 0x384   :  { %p662_p1 = pnand %p660_p0, %p657_p13 }
 0x386   :  { %665 = shalt.err (!%p662_p1)
}
 0x387   :  { %460 = dma.vmem_to_hbm [thread:$0]  %s458_s7, 128, %s858_s9, [#allocation4]  }
 0x388   :  { %668 = dma.done.wait [#allocation4], 128  }
 0x389   :  { %669 = vsyncadd [#allocation4], 4294967168 }
 0x38a   :  { %464 = vsyncpa [#allocation3], 1 }
 0x38b   :  { %465 = vsyncpa [#allocation4], 1 }

</bundles_post_ra>
